<compile_context>
chip_gen: v7x
topology: tpu7x:2x2x1
jax: 0.10.0
libtpu: 0.0.40
codegen_flags: <defaults>
</compile_context>

<pallas_src>
import jax
import jax.numpy as jnp
from jax import lax
from jax.experimental import pallas as pl
from jax.experimental.pallas import tpu as pltpu


def _round_up(x, m):
    return ((x + m - 1) // m) * m


# ---------------------------------------------------------------------------
# Stage 1: per-node feature extraction + per-graph segment sum.
# Grid = (num_cores, node_tiles_per_core).  Each core accumulates its own
# partial per-graph sum directly into its resident output slab.
# ---------------------------------------------------------------------------
def _pool_kernel(xpe_ref, ids_ref, wfp_ref, part_ref):
    i = pl.program_id(1)

    @pl.when(i == 0)
    def _init():
        part_ref[...] = jnp.zeros_like(part_ref)

    # Placeholder feature extractor (stands in for the torch.load'ed backbone):
    # fused single matmul [x | pe] @ [Wf ; Wp], f32 accumulation on the MXU.
    h = jnp.dot(xpe_ref[...], wfp_ref[...], preferred_element_type=jnp.float32)
    h = jnp.maximum(h, 0.0)                                     # ReLU in f32

    # dgl.mean_nodes numerator: exact segment-sum via in-kernel one-hot matmul.
    n_graphs = part_ref.shape[1]
    tile_bn = ids_ref.shape[1]
    gids = lax.broadcasted_iota(jnp.int32, (n_graphs, tile_bn), 0)
    onehot = (gids == ids_ref[...]).astype(xpe_ref.dtype)       # 0/1 exact in bf16
    part_ref[0] += jnp.dot(onehot, h.astype(xpe_ref.dtype),
                           preferred_element_type=jnp.float32)


# ---------------------------------------------------------------------------
# Stage 2: combine per-core partials, mean over nodes, MLPReadout, softmax.
# Runs once (no grid); all math in f32.
# ---------------------------------------------------------------------------
def _readout_kernel(part_ref, cnt_ref, w0_ref, b0_ref, w1_ref, b1_ref,
                    w2_ref, b2_ref, out_ref):
    hg = jnp.sum(part_ref[...], axis=0) / jnp.maximum(cnt_ref[...], 1.0)

    y = jnp.dot(hg, w0_ref[...], preferred_element_type=jnp.float32) + b0_ref[...]
    y = jnp.maximum(y, 0.0)
    y = jnp.dot(y, w1_ref[...], preferred_element_type=jnp.float32) + b1_ref[...]
    y = jnp.maximum(y, 0.0)
    y = jnp.dot(y, w2_ref[...], preferred_element_type=jnp.float32) + b2_ref[...]

    # Padded class columns carry a -1e30 bias -> exp underflows to 0, so the
    # softmax over the lane-dense 128 slab equals softmax over the real classes.
    m = jnp.max(y, axis=1, keepdims=True)
    e = jnp.exp(y - m)
    out_ref[...] = e / jnp.sum(e, axis=1, keepdims=True)


def transformer_graph_class_forward(batch_x, batch_pe, node_graph_id, num_graphs,
                                    params, *, compute_dtype=jnp.bfloat16,
                                    max_tile_bn=4096, num_cores=2):
    """batch_x: (BN, in_dim), batch_pe: (BN, pos_enc), node_graph_id: (BN,) int."""
    BN, in_dim = batch_x.shape
    pos_enc = batch_pe.shape[1]
    out_dim = params["wf"].shape[1]
    num_classes = params["w2"].shape[1]
    B = int(num_graphs)
    NC = max(1, int(num_cores))
    itemsize = jnp.dtype(compute_dtype).itemsize

    # ---- fuse [x | pe] with [Wf ; Wp]; zero-pad K and out_dim to 128 (exact) ----
    Kc = in_dim + pos_enc
    Kc_pad = _round_up(Kc, 128)
    Dp = _round_up(out_dim, 128)
    xpe = jnp.concatenate([batch_x, batch_pe], axis=1).astype(compute_dtype)
    xpe = jnp.pad(xpe, ((0, 0), (0, Kc_pad - Kc)))
    wfp = jnp.concatenate([params["wf"], params["wp"]], axis=0).astype(compute_dtype)
    wfp = jnp.pad(wfp, ((0, Kc_pad - Kc), (0, Dp - out_dim)))

    # ---- generation-aware VMEM budget & node-tile size ----
    try:
        phys_vmem = int(pltpu.get_tpu_info().vmem_capacity_bytes)
    except Exception:
        phys_vmem = 64 * 1024 * 1024          # conservative (v7x per-core) default
    budget = int(phys_vmem * 0.70)

    def _est_vmem(tile_bn, n_weight_bufs):
        return (2 * tile_bn * Kc_pad * itemsize        # double-buffered xpe tile
                + 2 * 8 * tile_bn * 4                  # ids tile (sublane-padded)
                + n_weight_bufs * Kc_pad * Dp * itemsize   # resident fused weights
                + 2 * _round_up(B, 8) * Dp * 4         # resident output slab
                + (1 << 20))                           # slack

    TILE_BN = min(int(max_tile_bn), _round_up(max(1, -(-BN // NC)), 128))
    TILE_BN = max(128, _round_up(TILE_BN, 128))
    while TILE_BN > 128 and _est_vmem(TILE_BN, 2) > budget:
        TILE_BN = max(128, (TILE_BN // 2) // 128 * 128)

    NT = -(-BN // (NC * TILE_BN))                      # node tiles per core
    BN_pad = NC * NT * TILE_BN
    pad = BN_pad - BN
    xpe = jnp.pad(xpe, ((0, pad), (0, 0)))
    ids = jnp.pad(node_graph_id.astype(jnp.int32), (0, pad), constant_values=B)
    ids2d = ids.reshape(1, BN_pad)                     # sentinel id B never matches

    # ---- node counts precomputed outside the hot loop (free work) ----
    counts = jnp.zeros((B,), jnp.float32).at[node_graph_id].add(1.0).reshape(B, 1)

    # ---- stage 1: per-core partial per-graph feature sums ----
    def _run_pool(single_buffer_weights):
        if single_buffer_weights:
            wfp_spec = pl.BlockSpec(wfp.shape, lambda c, i: (0, 0),
                                    pipeline_mode=pl.Buffered(1))
        else:
            wfp_spec = pl.BlockSpec(wfp.shape, lambda c, i: (0, 0))
        n_wbuf = 1 if single_buffer_weights else 2
        vmem_limit = int(min(budget,
                             max(2 * _est_vmem(TILE_BN, n_wbuf), 16 * 1024 * 1024)))
        return pl.pallas_call(
            _pool_kernel,
            out_shape=jax.ShapeDtypeStruct((NC, B, Dp), jnp.float32),
            grid=(NC, NT),
            in_specs=[
                pl.BlockSpec((TILE_BN, Kc_pad), lambda c, i: (c * NT + i, 0)),
                pl.BlockSpec((1, TILE_BN), lambda c, i: (0, c * NT + i)),
                wfp_spec,
            ],
            out_specs=pl.BlockSpec((1, B, Dp), lambda c, i: (c, 0, 0)),
            compiler_params=pltpu.CompilerParams(
                dimension_semantics=("parallel", "arbitrary"),
                vmem_limit_bytes=vmem_limit),
        )(xpe, ids2d, wfp)

    try:
        partials = _run_pool(True)
    except Exception:
        # pipeline_mode=pl.Buffered(1) not supported by this jax build;
        # fall back to the default double-buffered constant weights.
        partials = _run_pool(False)

    # ---- stage 2 weights: MLPReadout in f32, class dim padded lane-dense ----
    C_PAD = max(128, _round_up(num_classes, 128))
    w0 = jnp.pad(params["w0"].astype(jnp.float32), ((0, Dp - out_dim), (0, 0)))
    b0 = params["b0"].astype(jnp.float32).reshape(1, -1)
    w1 = params["w1"].astype(jnp.float32)
    b1 = params["b1"].astype(jnp.float32).reshape(1, -1)
    w2p = jnp.zeros((params["w2"].shape[0], C_PAD), jnp.float32)
    w2p = w2p.at[:, :num_classes].set(params["w2"].astype(jnp.float32))
    b2p = jnp.full((1, C_PAD), -1e30, jnp.float32)
    b2p = b2p.at[:, :num_classes].set(params["b2"].astype(jnp.float32).reshape(1, -1))

    out_padded = pl.pallas_call(
        _readout_kernel,
        out_shape=jax.ShapeDtypeStruct((B, C_PAD), jnp.float32),
    )(partials, counts, w0, b0, w1, b1, w2p, b2p)

    return out_padded[:, :num_classes]


def _init_params(key, in_dim, pos_enc_size, out_dim, num_classes):
    ks = jax.random.split(key, 8)
    d0, d1, d2 = out_dim, out_dim // 2, out_dim // 4
    return {
        # placeholder feature extractor (stands in for torch.load'ed backbone)
        "wf": jax.random.normal(ks[0], (in_dim, out_dim), jnp.float32) * 0.1,
        "wp": jax.random.normal(ks[1], (pos_enc_size, out_dim), jnp.float32) * 0.1,
        # MLPReadout: out_dim -> out_dim//2 -> out_dim//4 -> num_classes
        "w0": jax.random.normal(ks[2], (d0, d1), jnp.float32) * 0.1,
        "b0": jax.random.normal(ks[3], (1, d1), jnp.float32) * 0.01,
        "w1": jax.random.normal(ks[4], (d1, d2), jnp.float32) * 0.1,
        "b1": jax.random.normal(ks[5], (1, d2), jnp.float32) * 0.01,
        "w2": jax.random.normal(ks[6], (d2, num_classes), jnp.float32) * 0.1,
        "b2": jax.random.normal(ks[7], (1, num_classes), jnp.float32) * 0.01,
    }


def _reference(batch_x, batch_pe, node_graph_id, num_graphs, params):
    h = jnp.maximum(batch_x @ params["wf"] + batch_pe @ params["wp"], 0.0)
    one_hot = jax.nn.one_hot(node_graph_id, num_graphs, dtype=jnp.float32)
    counts = jnp.maximum(jnp.sum(one_hot, axis=0), 1.0)
    hg = (one_hot.T @ h) / counts[:, None]
    y = jnp.maximum(hg @ params["w0"] + params["b0"], 0.0)
    y = jnp.maximum(y @ params["w1"] + params["b1"], 0.0)
    y = y @ params["w2"] + params["b2"]
    return jax.nn.softmax(y, axis=1)


if __name__ == "__main__":
    key = jax.random.PRNGKey(0)
    k_x, k_pe, k_p = jax.random.split(key, 3)

    # small synthetic "batched graph": 2 graphs, 8 nodes each
    num_graphs = 2
    nodes_per_graph = 8
    BN = num_graphs * nodes_per_graph
    in_dim, pos_enc_size, out_dim, num_classes = 16, 8, 32, 4

    batch_x = jax.random.normal(k_x, (BN, in_dim), jnp.float32)
    batch_pe = jax.random.normal(k_pe, (BN, pos_enc_size), jnp.float32)
    node_graph_id = jnp.repeat(jnp.arange(num_graphs), nodes_per_graph)

    params = _init_params(k_p, in_dim, pos_enc_size, out_dim, num_classes)
    ref = _reference(batch_x, batch_pe, node_graph_id, num_graphs, params)

    # f32 path: strict correctness check
    out_f32 = transformer_graph_class_forward(
        batch_x, batch_pe, node_graph_id, num_graphs, params,
        compute_dtype=jnp.float32)
    out_f32 = jax.block_until_ready(out_f32)
    assert out_f32.shape == (num_graphs, num_classes)
    assert jnp.allclose(out_f32, ref, atol=1e-4, rtol=1e-4), "f32 mismatch vs reference"
    assert jnp.allclose(jnp.sum(out_f32, axis=1), 1.0, atol=1e-5), "softmax rows must sum to 1"

    # default bf16-operand path (MXU peak on v6e/v7x): loose tolerance, f32 accumulation
    out_bf16 = transformer_graph_class_forward(
        batch_x, batch_pe, node_graph_id, num_graphs, params)
    out_bf16 = jax.block_until_ready(out_bf16)
    assert out_bf16.shape == (num_graphs, num_classes)
    assert jnp.allclose(out_bf16, ref, atol=3e-2, rtol=0.0), "bf16 mismatch vs reference"
    assert jnp.allclose(jnp.sum(out_bf16, axis=1), 1.0, atol=1e-3), "softmax rows must sum to 1"

    print("KERNEL_OK")
</pallas_src>

<mosaic_0001>
module attributes {stable_mosaic.version = 11 : i64} {
  func.func @_pool_kernel(%arg0: i32, %arg1: i32, %arg2: memref<128x128xf32, #tpu.memory_space<vmem>>, %arg3: memref<1x128xi32, #tpu.memory_space<vmem>>, %arg4: memref<128x128xf32, #tpu.memory_space<vmem>>, %arg5: memref<1x2x128xf32, #tpu.memory_space<vmem>>) attributes {dimension_semantics = [#tpu.dimension_semantics<parallel>, #tpu.dimension_semantics<arbitrary>], iteration_bounds = array<i64: 2, 1>, scalar_prefetch = 0 : i64, scratch_operands = 0 : i64, tpu.core_type = #tpu.core_type<tc>, window_params = [{transform_indices = @transform_0, window_bounds = array<i64: 128, 128>}, {transform_indices = @transform_1, window_bounds = array<i64: 1, 128>}, {pipeline_mode = #tpu.pipeline_mode<synchronous>, transform_indices = @transform_2, window_bounds = array<i64: 128, 128>}, {transform_indices = @transform_3, window_bounds = array<i64: 1, 2, 128>}]} {
    %c0_i32 = arith.constant 0 : i32
    %0 = arith.cmpi eq, %arg1, %c0_i32 : i32
    %1 = arith.extui %0 : i1 to i32
    %c0_i32_0 = arith.constant 0 : i32
    %2 = arith.cmpi ne, %1, %c0_i32_0 : i32
    scf.if %2 {
      %cst_14 = arith.constant 0.000000e+00 : f32
      %21 = vector.broadcast %cst_14 : f32 to vector<1x2x128xf32>
      %c0_15 = arith.constant 0 : index
      %c0_16 = arith.constant 0 : index
      %c0_17 = arith.constant 0 : index
      %22 = vector.load %arg5[%c0_15, %c0_16, %c0_17] : memref<1x2x128xf32, #tpu.memory_space<vmem>>, vector<1x2x128xf32>
      tpu.vector_store %arg5[%c0_15, %c0_16, %c0_17], %21 {strides = array<i32>} : memref<1x2x128xf32, #tpu.memory_space<vmem>>, vector<1x2x128xf32>,
    } else {
    }
    %c0 = arith.constant 0 : index
    %c0_1 = arith.constant 0 : index
    %3 = vector.load %arg2[%c0, %c0_1] : memref<128x128xf32, #tpu.memory_space<vmem>>, vector<128x128xf32>
    %c0_2 = arith.constant 0 : index
    %c0_3 = arith.constant 0 : index
    %4 = vector.load %arg4[%c0_2, %c0_3] : memref<128x128xf32, #tpu.memory_space<vmem>>, vector<128x128xf32>
    %cst = arith.constant dense<0.000000e+00> : vector<128x128xf32>
    %5 = tpu.matmul %3, %4, %cst {dimension_numbers = #tpu.dot_dimension_numbers<[1], [0], [0], [1], [0, 0, 1, 1], [], []>} : vector<128x128xf32>, vector<128x128xf32>, vector<128x128xf32> -> vector<128x128xf32>
    %cst_4 = arith.constant 0.000000e+00 : f32
    %6 = vector.broadcast %cst_4 : f32 to vector<128x128xf32>
    %7 = arith.maximumf %5, %6 : vector<128x128xf32>
    %8 = tpu.iota {dimensions = array<i32: 0>} : vector<2x128xi32>
    %c0_5 = arith.constant 0 : index
    %c0_6 = arith.constant 0 : index
    %9 = vector.load %arg3[%c0_5, %c0_6] : memref<1x128xi32, #tpu.memory_space<vmem>>, vector<1x128xi32>
    %10 = vector.broadcast %9 : vector<1x128xi32> to vector<2x128xi32>
    %11 = arith.cmpi eq, %8, %10 : vector<2x128xi32>
    %12 = arith.extui %11 : vector<2x128xi1> to vector<2x128xi32>
    %13 = arith.sitofp %12 : vector<2x128xi32> to vector<2x128xf32>
    %c0_7 = arith.constant 0 : index
    %c0_8 = arith.constant 0 : index
    %c0_9 = arith.constant 0 : index
    %14 = vector.load %arg5[%c0_7, %c0_8, %c0_9] : memref<1x2x128xf32, #tpu.memory_space<vmem>>, vector<1x2x128xf32>
    %15 = vector.shape_cast %14 : vector<1x2x128xf32> to vector<2x128xf32>
    %cst_10 = arith.constant dense<0.000000e+00> : vector<2x128xf32>
    %16 = tpu.matmul %13, %7, %cst_10 {dimension_numbers = #tpu.dot_dimension_numbers<[1], [0], [0], [1], [0, 0, 1, 1], [], []>} : vector<2x128xf32>, vector<128x128xf32>, vector<2x128xf32> -> vector<2x128xf32>
    %17 = arith.addf %15, %16 : vector<2x128xf32>
    %c0_11 = arith.constant 0 : index
    %c0_12 = arith.constant 0 : index
    %c0_13 = arith.constant 0 : index
    %18 = vector.load %arg5[%c0_11, %c0_12, %c0_13] : memref<1x2x128xf32, #tpu.memory_space<vmem>>, vector<1x2x128xf32>
    %19 = vector.shape_cast %18 : vector<1x2x128xf32> to vector<2x128xf32>
    %20 = vector.shape_cast %17 : vector<2x128xf32> to vector<1x2x128xf32>
    tpu.vector_store %arg5[%c0_11, %c0_12, %c0_13], %20 {strides = array<i32>} : memref<1x2x128xf32, #tpu.memory_space<vmem>>, vector<1x2x128xf32>,
    return
  }
  func.func @transform_0(%arg0: i32, %arg1: i32) -> (i32, i32) {
    %c1_i32 = arith.constant 1 : i32
    %0 = arith.muli %arg0, %c1_i32 : i32
    %1 = arith.addi %0, %arg1 : i32
    %c0_i32 = arith.constant 0 : i32
    %c0_i32_0 = arith.constant 0 : i32
    return %1, %c0_i32 : i32, i32
  }
  func.func @transform_1(%arg0: i32, %arg1: i32) -> (i32, i32) {
    %c1_i32 = arith.constant 1 : i32
    %0 = arith.muli %arg0, %c1_i32 : i32
    %1 = arith.addi %0, %arg1 : i32
    %c0_i32 = arith.constant 0 : i32
    %c0_i32_0 = arith.constant 0 : i32
    return %c0_i32, %1 : i32, i32
  }
  func.func @transform_2(%arg0: i32, %arg1: i32) -> (i32, i32) {
    %c0_i32 = arith.constant 0 : i32
    %c0_i32_0 = arith.constant 0 : i32
    %c0_i32_1 = arith.constant 0 : i32
    return %c0_i32, %c0_i32_0 : i32, i32
  }
  func.func @transform_3(%arg0: i32, %arg1: i32) -> (i32, i32, i32) {
    %c0_i32 = arith.constant 0 : i32
    %c0_i32_0 = arith.constant 0 : i32
    %c0_i32_1 = arith.constant 0 : i32
    return %arg0, %c0_i32, %c0_i32_0 : i32, i32, i32
  }
}

module attributes {stable_mosaic.version = 11 : i64} {
  func.func @_pool_kernel(%arg0: i32, %arg1: i32, %arg2: memref<128x128xf32, #tpu.memory_space<vmem>>, %arg3: memref<1x128xi32, #tpu.memory_space<vmem>>, %arg4: memref<128x128xf32, #tpu.memory_space<vmem>>, %arg5: memref<1x2x128xf32, #tpu.memory_space<vmem>>) attributes {dimension_semantics = [#tpu.dimension_semantics<parallel>, #tpu.dimension_semantics<arbitrary>], iteration_bounds = array<i64: 2, 1>, scalar_prefetch = 0 : i64, scratch_operands = 0 : i64, tpu.core_type = #tpu.core_type<tc>, window_params = [{transform_indices = @transform_0, window_bounds = array<i64: 128, 128>}, {transform_indices = @transform_1, window_bounds = array<i64: 1, 128>}, {pipeline_mode = #tpu.pipeline_mode<synchronous>, transform_indices = @transform_2, window_bounds = array<i64: 128, 128>}, {transform_indices = @transform_3, window_bounds = array<i64: 1, 2, 128>}]} {
    %c0_i32 = arith.constant 0 : i32
    %0 = arith.cmpi eq, %arg1, %c0_i32 : i32
    %1 = arith.extui %0 : i1 to i32
    %c0_i32_0 = arith.constant 0 : i32
    %2 = arith.cmpi ne, %1, %c0_i32_0 : i32
    scf.if %2 {
      %cst_14 = arith.constant 0.000000e+00 : f32
      %21 = vector.broadcast %cst_14 : f32 to vector<1x2x128xf32>
      %c0_15 = arith.constant 0 : index
      %c0_16 = arith.constant 0 : index
      %c0_17 = arith.constant 0 : index
      %22 = vector.load %arg5[%c0_15, %c0_16, %c0_17] : memref<1x2x128xf32, #tpu.memory_space<vmem>>, vector<1x2x128xf32>
      tpu.vector_store %arg5[%c0_15, %c0_16, %c0_17], %21 {strides = array<i32>} : memref<1x2x128xf32, #tpu.memory_space<vmem>>, vector<1x2x128xf32>,
    } else {
    }
    %c0 = arith.constant 0 : index
    %c0_1 = arith.constant 0 : index
    %3 = vector.load %arg2[%c0, %c0_1] : memref<128x128xf32, #tpu.memory_space<vmem>>, vector<128x128xf32>
    %c0_2 = arith.constant 0 : index
    %c0_3 = arith.constant 0 : index
    %4 = vector.load %arg4[%c0_2, %c0_3] : memref<128x128xf32, #tpu.memory_space<vmem>>, vector<128x128xf32>
    %cst = arith.constant dense<0.000000e+00> : vector<128x128xf32>
    %5 = tpu.matmul %3, %4, %cst {dimension_numbers = #tpu.dot_dimension_numbers<[1], [0], [0], [1], [0, 0, 1, 1], [], []>} : vector<128x128xf32>, vector<128x128xf32>, vector<128x128xf32> -> vector<128x128xf32>
    %cst_4 = arith.constant 0.000000e+00 : f32
    %6 = vector.broadcast %cst_4 : f32 to vector<128x128xf32>
    %7 = arith.maximumf %5, %6 : vector<128x128xf32>
    %8 = tpu.iota {dimensions = array<i32: 0>} : vector<2x128xi32>
    %c0_5 = arith.constant 0 : index
    %c0_6 = arith.constant 0 : index
    %9 = vector.load %arg3[%c0_5, %c0_6] : memref<1x128xi32, #tpu.memory_space<vmem>>, vector<1x128xi32>
    %10 = vector.broadcast %9 : vector<1x128xi32> to vector<2x128xi32>
    %11 = arith.cmpi eq, %8, %10 : vector<2x128xi32>
    %12 = arith.extui %11 : vector<2x128xi1> to vector<2x128xi32>
    %13 = arith.sitofp %12 : vector<2x128xi32> to vector<2x128xf32>
    %c0_7 = arith.constant 0 : index
    %c0_8 = arith.constant 0 : index
    %c0_9 = arith.constant 0 : index
    %14 = vector.load %arg5[%c0_7, %c0_8, %c0_9] : memref<1x2x128xf32, #tpu.memory_space<vmem>>, vector<1x2x128xf32>
    %15 = vector.shape_cast %14 : vector<1x2x128xf32> to vector<2x128xf32>
    %cst_10 = arith.constant dense<0.000000e+00> : vector<2x128xf32>
    %16 = tpu.matmul %13, %7, %cst_10 {dimension_numbers = #tpu.dot_dimension_numbers<[1], [0], [0], [1], [0, 0, 1, 1], [], []>} : vector<2x128xf32>, vector<128x128xf32>, vector<2x128xf32> -> vector<2x128xf32>
    %17 = arith.addf %15, %16 : vector<2x128xf32>
    %c0_11 = arith.constant 0 : index
    %c0_12 = arith.constant 0 : index
    %c0_13 = arith.constant 0 : index
    %18 = vector.load %arg5[%c0_11, %c0_12, %c0_13] : memref<1x2x128xf32, #tpu.memory_space<vmem>>, vector<1x2x128xf32>
    %19 = vector.shape_cast %18 : vector<1x2x128xf32> to vector<2x128xf32>
    %20 = vector.shape_cast %17 : vector<2x128xf32> to vector<1x2x128xf32>
    tpu.vector_store %arg5[%c0_11, %c0_12, %c0_13], %20 {strides = array<i32>} : memref<1x2x128xf32, #tpu.memory_space<vmem>>, vector<1x2x128xf32>,
    return
  }
  func.func @transform_0(%arg0: i32, %arg1: i32) -> (i32, i32) {
    %c1_i32 = arith.constant 1 : i32
    %0 = arith.muli %arg0, %c1_i32 : i32
    %1 = arith.addi %0, %arg1 : i32
    %c0_i32 = arith.constant 0 : i32
    %c0_i32_0 = arith.constant 0 : i32
    return %1, %c0_i32 : i32, i32
  }
  func.func @transform_1(%arg0: i32, %arg1: i32) -> (i32, i32) {
    %c1_i32 = arith.constant 1 : i32
    %0 = arith.muli %arg0, %c1_i32 : i32
    %1 = arith.addi %0, %arg1 : i32
    %c0_i32 = arith.constant 0 : i32
    %c0_i32_0 = arith.constant 0 : i32
    return %c0_i32, %1 : i32, i32
  }
  func.func @transform_2(%arg0: i32, %arg1: i32) -> (i32, i32) {
    %c0_i32 = arith.constant 0 : i32
    %c0_i32_0 = arith.constant 0 : i32
    %c0_i32_1 = arith.constant 0 : i32
    return %c0_i32, %c0_i32_0 : i32, i32
  }
  func.func @transform_3(%arg0: i32, %arg1: i32) -> (i32, i32, i32) {
    %c0_i32 = arith.constant 0 : i32
    %c0_i32_0 = arith.constant 0 : i32
    %c0_i32_1 = arith.constant 0 : i32
    return %arg0, %c0_i32, %c0_i32_0 : i32, i32, i32
  }
}

</mosaic_0001>

<bundles_post_ra>
// kernel: tpu_custom_call.1
= control target key start
LH: loop header
LB: loop body
LE: loop exit
PB: predicated region body
PF: predicated region fallthrough
CT: control target
= control target key end

     0   :  { %8 = vsyncpa [#allocation3], 0  ;;  %s1366_s0 = inlined_call_operand.hbm [shape: f32[256,128], index: 0, kind: input, shape index: {}]   ;;  %s1367_s1 = inlined_call_operand.vmem [shape: s32[1,256], index: 1, kind: input, shape index: {}]   ;;  %s1368_s2 = inlined_call_operand.hbm [shape: f32[128,128], index: 2, kind: input, shape index: {}]   ;;  %s1369_s3 = inlined_call_operand.hbm [shape: f32[2,2,128], index: 3, kind: output, shape index: {}]  }
   0x1   :  { %10 = vsyncpa [#allocation3 + $0x1], 0 }
   0x2   :  { %11 = vsyncpa [#allocation6], 0 }
   0x3   :  { %12 = vsyncpa [#allocation4], 0 }
   0x4   :  { %14 = vsyncpa [#allocation4 + $0x1], 0  ;;  %s1105_s12 = smov 0   ;;  %s1107_s13 = smov 0  }
   0x5   :  { %s1109_s14 = smov 0   ;;  %s1111_s15 = smov 0  }
   0x6   :  { %s1113_s16 = smov 0   ;;  %s1115_s17 = smov 0  }
   0x7 LB: > { %s635_s18 = sadd.s32 4294967295, %s1074_s17   ;;  %s636_s19 = sadd.s32 4294967294, %s1074_s17   ;;  %s1074_s17 = sphi %s1115_s17, %s20_s17   ;;  %s1070_s16 = sphi %s1113_s16, %s1393_s16   ;;  %s1066_s15 = sphi %s1111_s15, %s1392_s15   ;;  %s1062_s14 = sphi %s1109_s14, %s1391_s14   ;;  %s1058_s13 = sphi %s1107_s13, %s1390_s13   ;;  %s1054_s12 = sphi %s1105_s12, %s1389_s12  }
   0x8   : > { %p54_p0 = scmp.ne.s32.totalorder %s1058_s13, %s1054_s12  ;;  %p1139_p1 = scmp.eq.s32.totalorder %s635_s18, 0 }
   0x9   : > { %p1143_p2 = scmp.eq.s32.totalorder %s635_s18, 1  ;;  %p133_p3 = scmp.eq.s32.totalorder %s636_s19, 1 }
   0xa   : > { %s1374_s20 = scalar_select %p1139_p1, 1, 0 }
   0xb   : > { %s1375_s21 = scalar_select %p1143_p2, 1, 0 }
   0xc   : > { %p1149_p4 = por %p1139_p1, %p54_p0  ;;  %p637_p5 = scmp.ge.s32.totalorder %s1074_s17, 1 }
   0xd   : > { %p1154_p6 = por %p133_p3, %p54_p0  ;;  %p140_p7 = scmp.lt.s32.totalorder %s1074_s17, 3 }
   0xe   : > { %s1376_s22 = scalar_select %p1149_p4, 1, 0 }
   0xf   : > { %s1377_s23 = scalar_select %p1154_p6, 1, 0 }
  0x10   : > { %p1159_p8 = pnand %p637_p5, %p140_p7  ;;  %s1076_s25 = smov [#allocation5]  }
  0x11   : > { %s152_s26 = sshll.u32 %s1076_s25, 4  ;;  %s32_s28 = sadd.s32 1, %s1070_s16  ;;  %s153_s26 = int_to_ptr.vmem [resolvable:$true] %s152_s26 }
  0x12   : > { %s1378_s24 = scalar_select %p1159_p8, 1, 0 }
  0x13   : > { %p859_p9 = pneg %p1159_p8  ;;  %s930_s4 = scalar_lea.hbm %s1368_s2, 2048 }
  0x14   : > { %p931_p12 = scmp.ne.s32.totalorder %s1368_s2, %s930_s4  ;;  %p937_p5 = scmp.lt.u32.totalorder %s930_s4, %s1368_s2 }
  0x15   : > { %p1168_p11 = pnand %p859_p9, %p1139_p1 }
  0x17   : > { %p932_p13 = pneg %p1168_p11 }
  0x19   : > { %p933_p0 = pnand %p932_p13, %p931_p12 }
  0x1b   : > { %p934_p3 = pneg %p933_p0 }
  0x1d   : > { %p939_p7 = pnand %p937_p5, %p934_p3 }
  0x1f   : > { %942 = shalt.err (!%p939_p7)
}
  0x20   : > { %s943_s9 = scalar_lea.vmem %s153_s26, 2048  ;;  %p951_p1 = scmp.lt.s32.totalorder %s153_s26, %s153_s26 }
  0x21   : > { %p944_p9 = scmp.ne.s32.totalorder %s153_s26, %s943_s9  ;;  %p952_p4 = scmp.lt.s32.totalorder %s943_s9, %s943_s9 }
  0x23   : > { %p946_p10 = pnand %p944_p9, %p932_p13  ;;  %p953_p8 = por %p952_p4, %p951_p1 }
  0x25   : > { %p947_p6 = pneg %p946_p10 }
  0x27   : > { %p954_p2 = pnand %p953_p8, %p947_p6 }
  0x29   : > { %957 = shalt.err (!%p954_p2)
}
  0x2a   : > { %s1077_s10 = smov 128   ;;  %s1078_s11 = smov 8  }
  0x2b   : > { %862 = dma.hbm_to_vmem [thread:$0]  (!%p1168_p11), %s1368_s2, 2048, %s153_s26, [#allocation6], %s1077_s10, %s1077_s10, %s1078_s11  }
  0x2c   : > { %p34_p1 = scmp.ge.s32.totalorder %s32_s28, 2  ;;  %s41_s25 = sadd.s32 1, %s1062_s14 }
  0x2d   : > { %p48_p2 = scmp.ne.s32.totalorder %s1062_s14, %s1058_s13  ;;  %p49_p4 = scmp.eq.s32.totalorder %s1074_s17, 0 }
  0x2e   : > { %s1395_s28 = smov (%p34_p1, %s32_s28), 0  ;;  %p1381_p8 = scmp.ne.s32.totalorder %s1375_s21, 0 }
  0x2f   : > { %p1198_p6 = por %p49_p4, %p48_p2  ;;  %s38_s30 = ssub.s32 %s1070_s16, %s1395_s28 }
  0x30   : > { %p1204_p10 = por %p1381_p8, %p48_p2  ;;  %p872_p12 = scmp.lt.s32.totalorder %s1074_s17, 2 }
  0x31   : > { %p39_p11 = scmp.eq.s32.totalorder %s38_s30, 0  ;;  %s166_s26 = sand.u32 1, %s1062_s14  }
  0x32   : > { %s640_s4 = sshll.u32 %s166_s26, 7  ;;  %s654_s6 = sshll.u32 %s1070_s16, 11 }
  0x33   : > { %s1213_s5 = scalar_select %p39_p11, %s1062_s14, %s41_s25  }
  0x34   : > { %s1219_s9 = scalar_lea.hbm %s1366_s0, %s654_s6  ;;  %s170_s21 = scalar_lea.vmem [#allocation2], %s640_s4 }
  0x35   : > { %s178_s18 = sshll.u32 %s170_s21, 4  ;;  %p1225_p13 = pnand %p872_p12, %p1198_p6  ;;  %s1221_s18 = int_to_ptr.vmem [resolvable:$true] %s178_s18 }
  0x36   : > { %s1229_s25 = scalar_lea.sflag [#allocation3], %s166_s26  ;;  %s958_s30 = scalar_lea.hbm %s1219_s9, 2048 }
  0x37   : > { %p959_p0 = scmp.ne.s32.totalorder %s1219_s9, %s958_s30  ;;  %p960_p3 = pneg %p1225_p13 }
  0x38   : > { %s963_s29 = scalar_lea.hbm %s1366_s0, 4096  ;;  %p964_p9 = scmp.lt.u32.totalorder %s1219_s9, %s1366_s0 }
  0x39   : > { %p961_p5 = pnand %p960_p3, %p959_p0  ;;  %p965_p1 = scmp.lt.u32.totalorder %s963_s29, %s958_s30 }
  0x3a   : > { %p967_p4 = scmp.lt.u32.totalorder %s958_s30, %s1219_s9 }
  0x3b   : > { %p962_p7 = pneg %p961_p5  ;;  %p966_p2 = por %p965_p1, %p964_p9 }
  0x3d   : > { %p968_p6 = por %p967_p4, %p966_p2 }
  0x3f   : > { %p969_p8 = pnand %p968_p6, %p962_p7 }
  0x41   : > { %972 = shalt.err (!%p969_p8)
}
  0x42   : > { %s973_s26 = scalar_lea.vmem %s1221_s18, 2048  ;;  %s1079_s21 = smov [#allocation2]  }
  0x43   : > { %p974_p12 = scmp.ne.s32.totalorder %s1221_s18, %s973_s26  ;;  %s978_s4 = sshll.u32 %s1079_s21, 4  ;;  %s979_s4 = int_to_ptr.vmem [resolvable:$false] %s978_s4 }
  0x44   : > { %s980_s6 = scalar_lea.vmem %s979_s4, 4096  ;;  %p981_p5 = scmp.lt.s32.totalorder %s1221_s18, %s979_s4 }
  0x45   : > { %p976_p11 = pnand %p974_p12, %p960_p3  ;;  %p982_p9 = scmp.lt.s32.totalorder %s980_s6, %s973_s26 }
  0x47   : > { %p977_p0 = pneg %p976_p11  ;;  %p983_p1 = por %p982_p9, %p981_p5 }
  0x49   : > { %p984_p2 = pnand %p983_p1, %p977_p0 }
  0x4b   : > { %987 = shalt.err (!%p984_p2)
}
  0x4c   : > { %866 = dma.hbm_to_vmem [thread:$0]  (!%p1225_p13), %s1219_s9, 2048, %s1221_s18, %s1229_s25, %s1077_s10, %s1077_s10, %s1078_s11  }
  0x4d   : > { %p1384_p3 = scmp.ne.s32.totalorder %s1378_s24, 0 }
  0x4e   : > { %s1263_s30 = sand.u32 (!%p1384_p3), 1, %s1058_s13   ;;  %p1385_p7 = scmp.ne.s32.totalorder (!%p1384_p3), %s1376_s22, 0 }
  0x4f   : > { %198 = sbr.rel (%p1384_p3) target bundleno = 601 (0x259), region = 32  ;;  %s644_s29 = sshll.u32 (!%p1384_p3), %s1263_s30, 7 }
  0x50   : > { %s201_s7 = scalar_lea.sflag (!%p1384_p3), [#allocation3], %s1263_s30  ;;  %s1267_s8 = scalar_lea.vmem (!%p1384_p3), [#allocation2], %s644_s29 }
  0x56   : > { %1041 = dma.done.wait (%p1385_p7), %s201_s7, 2048  }
  0x57   : > { %1043 = vsyncadd (%p1385_p7), %s201_s7, 4294965248  ;;  %p1386_p13 = scmp.ne.s32.totalorder %s1374_s20, 0 }
  0x59   : > { %1045 = dma.done.wait (%p1386_p13), [#allocation6], 2048  }
  0x5a   : > { %1047 = vsyncadd (%p1386_p13), [#allocation6], 4294965248  ;;  %v263_v0 = vld [vmem:[#allocation5] sm:$0xff]  ;;  %v264_v1 = vld [vmem:[#allocation5 + $0x8] sm:$0xff]  ;;  %v1080_v40 = vmov 0.0|0.0   ;;  %s646_s20 = sshll.u32 %s1263_s30, 1 }
  0x5b   : > { %v265_v2 = vld [vmem:[#allocation5 + $0x10] sm:$0xff]  ;;  %v795_v3 = vpack.c.bf16 %v264_v1, %v263_v0  ;;  %v266_v4 = vld [vmem:[#allocation5 + $0x18] sm:$0xff]  ;;  %v267_v6 = vld [vmem:[#allocation5 + $0x20] sm:$0xff]  ;;  %827 = vmatprep.subr.bf16.mxu1 %v1080_v40  ;;  %vm1081_vm0 = vmmov 0   ;;  %v1082_v41 = vmov 0.0   ;;  %s1295_s22 = scalar_lea.vmem [#allocation7], %s646_s20 }
  0x5c   : > { %v799_v5 = vpack.c.bf16 %v266_v4, %v265_v2  ;;  %v268_v7 = vld [vmem:[#allocation5 + $0x28] sm:$0xff]  ;;  %v247_v9 = vld [vmem:[%s1267_s8] sm:$0xff]  ;;  %v269_v10 = vld [vmem:[#allocation5 + $0x30] sm:$0xff]  ;;  %792 = vmatprep.mubr.msk.f32.mxu1 %vm1081_vm0, %v1082_v41  ;;  %246 = vst [vmem:[%s1295_s22] sm:$0x3] %v1082_v41  ;;  %p238_p4 = scmp.lt.s32.totalorder %s1066_s15, 1  ;;  %s651_s18 = sshll.u32 %s1066_s15, 5 }
  0x5d   : > { %796 = vmatprep.subr.bf16.mxu0 %v795_v3  ;;  %v803_v8 = vpack.c.bf16 %v268_v7, %v267_v6  ;;  %v270_v11 = vld [vmem:[#allocation5 + $0x38] sm:$0xff]  ;;  %736 = vmatprep.mubr.f32.mxu0 %v247_v9  ;;  %v271_v13 = vld [vmem:[#allocation5 + $0x40] sm:$0xff]  ;;  %v272_v14 = vld [vmem:[#allocation5 + $0x48] sm:$0xff]  ;;  %s537_s19 = sshll.u32 %s1295_s22, 4  ;;  %s1316_s21 = scalar_lea.hbm %s1369_s3, %s651_s18  ;;  %s1318_s19 = int_to_ptr.vmem [resolvable:$true] %s537_s19 }
  0x5e   : > { %798 = vmatpush3.bf16.msra.mxu0 %v795_v3  ;;  %v807_v12 = vpack.c.bf16 %v270_v11, %v269_v10  ;;  %v811_v15 = vpack.c.bf16 %v272_v14, %v271_v13  ;;  %v273_v16 = vld [vmem:[#allocation5 + $0x50] sm:$0xff]  ;;  %v274_v17 = vld [vmem:[#allocation5 + $0x58] sm:$0xff]  ;;  %v275_v19 = vld [vmem:[#allocation5 + $0x60] sm:$0xff]  ;;  %s239_s24 = scalar_select %p238_p4, %s1066_s15, 1 }
  0x5f   : > { %800 = vmatprep.subr.bf16.mxu0 %v799_v5  ;;  %v815_v18 = vpack.c.bf16 %v274_v17, %v273_v16  ;;  %v276_v20 = vld [vmem:[#allocation5 + $0x68] sm:$0xff]  ;;  %v277_v22 = vld [vmem:[#allocation5 + $0x70] sm:$0xff]  ;;  %v278_v23 = vld [vmem:[#allocation5 + $0x78] sm:$0xff]  ;;  %s524_s4 = scalar_lea.sflag [#allocation4], %s1263_s30  ;;  %s988_s6 = scalar_lea.vmem %s1318_s19, 32 }
  0x60   : > { %v819_v21 = vpack.c.bf16 %v276_v20, %v275_v19  ;;  %v823_v24 = vpack.c.bf16 %v278_v23, %v277_v22  ;;  %v248_v25 = vld [vmem:[%s1267_s8 + $0x8] sm:$0xff]  ;;  %v249_v26 = vld [vmem:[%s1267_s8 + $0x10] sm:$0xff]  ;;  %v250_v27 = vld [vmem:[%s1267_s8 + $0x18] sm:$0xff]  ;;  %s240_s9 = scalar_lea.vmem %s1367_s1, %s239_s24  ;;  %p989_p6 = scmp.ne.s32.totalorder %s1318_s19, %s988_s6 }
  0x61   : > { %v251_v28 = vld [vmem:[%s1267_s8 + $0x20] sm:$0xff]  ;;  %v252_v29 = vld [vmem:[%s1267_s8 + $0x28] sm:$0xff]  ;;  %v253_v30 = vld [vmem:[%s1267_s8 + $0x30] sm:$0xff]  ;;  %s1084_s15 = smov [#allocation7]  }
  0x62   : > { %802 = vmatpush3.bf16.msra.mxu0 %v799_v5  ;;  %v254_v31 = vld [vmem:[%s1267_s8 + $0x38] sm:$0xff]  ;;  %v255_v32 = vld [vmem:[%s1267_s8 + $0x40] sm:$0xff]  ;;  %v256_v33 = vld [vmem:[%s1267_s8 + $0x48] sm:$0xff]  ;;  %p990_p8 = pnand %p989_p6, %p1204_p10  ;;  %s992_s29 = sshll.u32 %s1084_s15, 4  ;;  %s993_s29 = int_to_ptr.vmem [resolvable:$false] %s992_s29 }
  0x63   : > { %804 = vmatprep.subr.bf16.mxu0 %v803_v8  ;;  %v257_v34 = vld [vmem:[%s1267_s8 + $0x50] sm:$0xff]  ;;  %v258_v35 = vld [vmem:[%s1267_s8 + $0x58] sm:$0xff]  ;;  %v259_v36 = vld [vmem:[%s1267_s8 + $0x60] sm:$0xff]  ;;  %s994_s7 = scalar_lea.vmem %s993_s29, 64  ;;  %p995_p11 = scmp.lt.s32.totalorder %s1318_s19, %s993_s29 }
  0x64   : > { %v260_v37 = vld [vmem:[%s1267_s8 + $0x68] sm:$0xff]  ;;  %v261_v38 = vld [vmem:[%s1267_s8 + $0x70] sm:$0xff]  ;;  %v262_v39 = vld [vmem:[%s1267_s8 + $0x78] sm:$0xff]  ;;  %p991_p12 = pneg %p990_p8  ;;  %p996_p0 = scmp.lt.s32.totalorder %s994_s7, %s988_s6 }
  0x65   : > { %v647_v19 = vld [vmem:[%s240_s9] ss:$0 sm:$0xff] }
  0x66   : > { %806 = vmatpush3.bf16.msra.mxu0 %v803_v8  ;;  %v450_v22 = vld [vmem:[%s1295_s22] sm:$0x3]  ;;  %p997_p5 = por %p996_p0, %p995_p11 }
  0x67   : > { %808 = vmatprep.subr.bf16.mxu0 %v807_v12 }
  0x68   : > { %p998_p9 = pnand %p997_p5, %p991_p12 }
  0x6a   : > { %810 = vmatpush3.bf16.msra.mxu0 %v807_v12  ;;  %v440_v12 = vlaneseq }
  0x6b   : > { %812 = vmatprep.subr.bf16.mxu0 %v811_v15 }
  0x6e   : > { %814 = vmatpush3.bf16.msra.mxu0 %v811_v15 }
  0x6f   : > { %816 = vmatprep.subr.bf16.mxu0 %v815_v18 }
  0x72   : > { %818 = vmatpush3.bf16.msra.mxu0 %v815_v18  ;;  %v441_v18 = vshrl.u32 %v440_v12, 7 }
  0x73   : > { %820 = vmatprep.subr.bf16.mxu0 %v819_v21 }
  0x74   : > { %vm447_vm1 = vcmp.eq.s32.totalorder %v441_v18, %v647_v19 }
  0x76   : > { %822 = vmatpush3.bf16.msra.mxu0 %v819_v21  ;;  %v1083_v21 = vmov 1.0  }
  0x77   : > { %824 = vmatprep.subr.bf16.mxu0 %v823_v24 }
  0x7a   : > { %826 = vmatpush3.bf16.msra.mxu0 %v823_v24 }
  0x7d   : > { %737 = vmatmul.mubr.f32.vlgmr.msra.gmra.mrb[0].mxu0 %v248_v25 }
  0x7e   : > { %739 = vmatprep.mubr.f32.mxu0 %v249_v26 }
  0x81   : > { %740 = vmatmul.mubr.f32.gmra.mrb[2].mxu0 %v250_v27 }
  0x82   : > { %742 = vmatprep.mubr.f32.mxu0 %v251_v28 }
  0x85   : > { %743 = vmatmul.mubr.f32.gmra.mrb[4].mxu0 %v252_v29 }
  0x86   : > { %745 = vmatprep.mubr.f32.mxu0 %v253_v30 }
  0x89   : > { %746 = vmatmul.mubr.f32.gmra.mrb[6].mxu0 %v254_v31 }
  0x8a   : > { %748 = vmatprep.mubr.f32.mxu0 %v255_v32 }
  0x8d   : > { %749 = vmatmul.mubr.f32.gmra.mrb[8].mxu0 %v256_v33 }
  0x8e   : > { %751 = vmatprep.mubr.f32.mxu0 %v257_v34 }
  0x91   : > { %752 = vmatmul.mubr.f32.gmra.mrb[10].mxu0 %v258_v35 }
  0x92   : > { %754 = vmatprep.mubr.f32.mxu0 %v259_v36 }
  0x95   : > { %755 = vmatmul.mubr.f32.gmra.mrb[12].mxu0 %v260_v37 }
  0x96   : > { %757 = vmatprep.mubr.f32.mxu0 %v261_v38 }
  0x99   : > { %758 = vmatmul.mubr.f32.gmra.mrb[14].mxu0 %v262_v39 }
 0x150   : > { %v738_v42 = vpop.f32.mrb[0].mxu0 }
 0x151   : > { %v425_v43 = vmax.f32 %v738_v42, 0.0  ;;  %v345_v44 = vpop.f32.mrb[1].mxu0 }
 0x152   : > { %v424_v45 = vmax.f32 %v345_v44, 0.0 }
 0x154   : > { %v741_v46 = vpop.f32.mrb[2].mxu0  ;;  %v828_v47 = vpack.c.bf16 %v425_v43, %v424_v45 }
 0x155   : > { %v427_v48 = vmax.f32 %v741_v46, 0.0  ;;  %v355_v49 = vpop.f32.mrb[3].mxu0 }
 0x156   : > { %v426_v50 = vmax.f32 %v355_v49, 0.0  ;;  %829 = vmatpush3.bf16.msra.mxu1 %v828_v47 }
 0x157   : > { %830 = vmatprep.subr.bf16.mxu1 %v1080_v40 }
 0x158   : > { %v831_v51 = vpack.c.bf16 %v427_v48, %v426_v50  ;;  %v744_v52 = vpop.f32.mrb[4].mxu0 }
 0x159   : > { %v429_v53 = vmax.f32 %v744_v52, 0.0  ;;  %v365_v54 = vpop.f32.mrb[5].mxu0 }
 0x15a   : > { %v428_v55 = vmax.f32 %v365_v54, 0.0  ;;  %832 = vmatpush3.bf16.msra.mxu1 %v831_v51 }
 0x15b   : > { %833 = vmatprep.subr.bf16.mxu1 %v1080_v40 }
 0x15c   : > { %v834_v56 = vpack.c.bf16 %v429_v53, %v428_v55  ;;  %v747_v57 = vpop.f32.mrb[6].mxu0 }
 0x15d   : > { %v431_v58 = vmax.f32 %v747_v57, 0.0  ;;  %v375_v59 = vpop.f32.mrb[7].mxu0 }
 0x15e   : > { %v430_v60 = vmax.f32 %v375_v59, 0.0  ;;  %835 = vmatpush3.bf16.msra.mxu1 %v834_v56 }
 0x15f   : > { %836 = vmatprep.subr.bf16.mxu1 %v1080_v40 }
 0x160   : > { %v837_v61 = vpack.c.bf16 %v431_v58, %v430_v60  ;;  %v750_v62 = vpop.f32.mrb[8].mxu0 }
 0x161   : > { %v433_v63 = vmax.f32 %v750_v62, 0.0  ;;  %v385_v0 = vpop.f32.mrb[9].mxu0 }
 0x162   : > { %v432_v1 = vmax.f32 %v385_v0, 0.0  ;;  %838 = vmatpush3.bf16.msra.mxu1 %v837_v61 }
 0x163   : > { %839 = vmatprep.subr.bf16.mxu1 %v1080_v40 }
 0x164   : > { %v840_v2 = vpack.c.bf16 %v433_v63, %v432_v1  ;;  %v753_v3 = vpop.f32.mrb[10].mxu0 }
 0x165   : > { %v435_v4 = vmax.f32 %v753_v3, 0.0  ;;  %v395_v5 = vpop.f32.mrb[11].mxu0 }
 0x166   : > { %v434_v6 = vmax.f32 %v395_v5, 0.0  ;;  %841 = vmatpush3.bf16.msra.mxu1 %v840_v2 }
 0x167   : > { %842 = vmatprep.subr.bf16.mxu1 %v1080_v40 }
 0x168   : > { %v843_v7 = vpack.c.bf16 %v435_v4, %v434_v6  ;;  %v756_v8 = vpop.f32.mrb[12].mxu0 }
 0x169   : > { %v437_v9 = vmax.f32 %v756_v8, 0.0  ;;  %v405_v10 = vpop.f32.mrb[13].mxu0 }
 0x16a   : > { %v436_v11 = vmax.f32 %v405_v10, 0.0  ;;  %844 = vmatpush3.bf16.msra.mxu1 %v843_v7 }
 0x16b   : > { %845 = vmatprep.subr.bf16.mxu1 %v1080_v40 }
 0x16c   : > { %v846_v13 = vpack.c.bf16 %v437_v9, %v436_v11  ;;  %v759_v14 = vpop.f32.mrb[14].mxu0 }
 0x16d   : > { %v439_v15 = vmax.f32 %v759_v14, 0.0  ;;  %v415_v16 = vpop.f32.mrb[15].mxu0 }
 0x16e   : > { %v438_v17 = vmax.f32 %v415_v16, 0.0  ;;  %847 = vmatpush3.bf16.msra.mxu1 %v846_v13 }
 0x16f   : > { %848 = vmatprep.subr.bf16.mxu1 %v1080_v40 }
 0x170   : > { %v849_v20 = vpack.c.bf16 %v439_v15, %v438_v17 }
 0x172   : > { %850 = vmatpush3.bf16.msra.mxu1 %v849_v20 }
 0x175   : > { %793 = vmatmul.mubr.msk.f32.vlgmr.msra.gmra.mrb[0].mxu1 %vm447_vm1, %v1083_v21 }
 0x248   : > { %v517_v23 = vpop.f32.mrb[0].mxu1 }
 0x249   : > { %v521_v24 = vadd.f32 %v517_v23, %v450_v22  ;;  %v794_v25 = vpop.f32.mrb[1].mxu1 }
 0x24b   : > { %522 = vst [vmem:[%s1295_s22] sm:$0x3] %v521_v24 }
 0x24c   : > { %1001 = shalt.err (!%p998_p9)
}
 0x24d   : > { %s1002_s30 = scalar_lea.hbm %s1316_s21, 32  ;;  %s1006_s22 = scalar_lea.hbm %s1369_s3, 64 }
 0x24e   : > { %p1003_p1 = scmp.ne.s32.totalorder %s1316_s21, %s1002_s30  ;;  %p1007_p7 = scmp.lt.u32.totalorder %s1316_s21, %s1369_s3 }
 0x24f   : > { %p1008_p13 = scmp.lt.u32.totalorder %s1006_s22, %s1002_s30  ;;  %p1010_p6 = scmp.lt.u32.totalorder %s1002_s30, %s1316_s21 }
 0x250   : > { %p1004_p2 = pnand %p1003_p1, %p1204_p10 }
 0x251   : > { %p1009_p4 = por %p1008_p13, %p1007_p7 }
 0x252   : > { %p1005_p3 = pneg %p1004_p2 }
 0x253   : > { %p1011_p8 = por %p1010_p6, %p1009_p4 }
 0x255   : > { %p1012_p12 = pnand %p1011_p8, %p1005_p3 }
 0x257   : > { %1015 = shalt.err (!%p1012_p12)
}
 0x258   : > { %857 = dma.vmem_to_hbm [thread:$0]  (%p1204_p10), %s1318_s19, 32, %s1316_s21, %s524_s4  }
 0x259 PF: > { %s549_s11 = sand.u32 1, %s1054_s12   ;;  %p1387_p11 = scmp.ne.s32.totalorder %s1377_s23, 0 }
 0x25a   : > { %p1388_p0 = scmp.ge.s32.totalorder %s1074_s17, 2  ;;  %s550_s9 = scalar_lea.sflag [#allocation4], %s549_s11 }
 0x25c   : > { %p868_p5 = pnand %p1388_p0, %p1387_p11 }
 0x25e   : > { %1049 = dma.done.wait (!%p868_p5), %s550_s9, 32  }
 0x25f   : > { %1051 = vsyncadd (!%p868_p5), %s550_s9, 4294967264  ;;  %s20_s17 = sadd.s32 1, %s1074_s17   ;;  %s1389_s12 = smov %s1058_s13 }
 0x260   : > { %p17_p9 = scmp.ge.s32.totalorder %s20_s17, 4   ;;  %s1390_s13 = smov %s1062_s14 }
 0x261   : > { %s1391_s14 = smov %s1213_s5  ;;  %s1392_s15 = smov %s1070_s16 }
 0x262   : > { %s1393_s16 = smov %s1395_s28  ;;  %19 = sbr.rel (!%p17_p9) target bundleno = 7 (0x7), region = 88 }
 0x269   :  { %555 = vsyncpa [#allocation3], 1 }
 0x26a   :  { %557 = vsyncpa [#allocation3 + $0x1], 1 }
 0x26b   :  { %558 = vsyncpa [#allocation6], 1 }
 0x26c   :  { %559 = vsyncpa [#allocation4], 1 }
 0x26d   :  { %561 = vsyncpa [#allocation4 + $0x1], 1 }

// kernel: tpu_custom_call.1
= control target key start
LH: loop header
LB: loop body
LE: loop exit
PB: predicated region body
PF: predicated region fallthrough
CT: control target
= control target key end

     0   :  { %8 = vsyncpa [#allocation3], 0  ;;  %s1366_s0 = inlined_call_operand.hbm [shape: f32[256,128], index: 0, kind: input, shape index: {}]   ;;  %s1367_s1 = inlined_call_operand.vmem [shape: s32[1,256], index: 1, kind: input, shape index: {}]   ;;  %s1368_s2 = inlined_call_operand.hbm [shape: f32[128,128], index: 2, kind: input, shape index: {}]   ;;  %s1369_s3 = inlined_call_operand.hbm [shape: f32[2,2,128], index: 3, kind: output, shape index: {}]  }
   0x1   :  { %10 = vsyncpa [#allocation3 + $0x1], 0 }
   0x2   :  { %11 = vsyncpa [#allocation6], 0 }
   0x3   :  { %12 = vsyncpa [#allocation4], 0 }
   0x4   :  { %14 = vsyncpa [#allocation4 + $0x1], 0  ;;  %s1105_s12 = smov 0   ;;  %s1107_s13 = smov 0  }
   0x5   :  { %s1109_s14 = smov 0   ;;  %s1111_s15 = smov 0  }
   0x6   :  { %s1113_s16 = smov 0   ;;  %s1115_s17 = smov 0  }
   0x7 LB: > { %s635_s18 = sadd.s32 4294967295, %s1074_s17   ;;  %s636_s19 = sadd.s32 4294967294, %s1074_s17   ;;  %s1074_s17 = sphi %s1115_s17, %s20_s17   ;;  %s1070_s16 = sphi %s1113_s16, %s1393_s16   ;;  %s1066_s15 = sphi %s1111_s15, %s1392_s15   ;;  %s1062_s14 = sphi %s1109_s14, %s1391_s14   ;;  %s1058_s13 = sphi %s1107_s13, %s1390_s13   ;;  %s1054_s12 = sphi %s1105_s12, %s1389_s12  }
   0x8   : > { %p54_p0 = scmp.ne.s32.totalorder %s1058_s13, %s1054_s12  ;;  %p1139_p1 = scmp.eq.s32.totalorder %s635_s18, 0 }
   0x9   : > { %p1143_p2 = scmp.eq.s32.totalorder %s635_s18, 1  ;;  %p133_p3 = scmp.eq.s32.totalorder %s636_s19, 1 }
   0xa   : > { %s1374_s20 = scalar_select %p1139_p1, 1, 0 }
   0xb   : > { %s1375_s21 = scalar_select %p1143_p2, 1, 0 }
   0xc   : > { %p1149_p4 = por %p1139_p1, %p54_p0  ;;  %p637_p5 = scmp.ge.s32.totalorder %s1074_s17, 1 }
   0xd   : > { %p1154_p6 = por %p133_p3, %p54_p0  ;;  %p140_p7 = scmp.lt.s32.totalorder %s1074_s17, 3 }
   0xe   : > { %s1376_s22 = scalar_select %p1149_p4, 1, 0 }
   0xf   : > { %s1377_s23 = scalar_select %p1154_p6, 1, 0 }
  0x10   : > { %p1159_p8 = pnand %p637_p5, %p140_p7  ;;  %s1076_s25 = smov [#allocation5]  }
  0x11   : > { %s152_s26 = sshll.u32 %s1076_s25, 4  ;;  %s32_s28 = sadd.s32 1, %s1070_s16  ;;  %s153_s26 = int_to_ptr.vmem [resolvable:$true] %s152_s26 }
  0x12   : > { %s1378_s24 = scalar_select %p1159_p8, 1, 0 }
  0x13   : > { %p859_p9 = pneg %p1159_p8  ;;  %s930_s4 = scalar_lea.hbm %s1368_s2, 2048 }
  0x14   : > { %p931_p12 = scmp.ne.s32.totalorder %s1368_s2, %s930_s4  ;;  %p937_p5 = scmp.lt.u32.totalorder %s930_s4, %s1368_s2 }
  0x15   : > { %p1168_p11 = pnand %p859_p9, %p1139_p1 }
  0x17   : > { %p932_p13 = pneg %p1168_p11 }
  0x19   : > { %p933_p0 = pnand %p932_p13, %p931_p12 }
  0x1b   : > { %p934_p3 = pneg %p933_p0 }
  0x1d   : > { %p939_p7 = pnand %p937_p5, %p934_p3 }
  0x1f   : > { %942 = shalt.err (!%p939_p7)
}
  0x20   : > { %s943_s9 = scalar_lea.vmem %s153_s26, 2048  ;;  %p951_p1 = scmp.lt.s32.totalorder %s153_s26, %s153_s26 }
  0x21   : > { %p944_p9 = scmp.ne.s32.totalorder %s153_s26, %s943_s9  ;;  %p952_p4 = scmp.lt.s32.totalorder %s943_s9, %s943_s9 }
  0x23   : > { %p946_p10 = pnand %p944_p9, %p932_p13  ;;  %p953_p8 = por %p952_p4, %p951_p1 }
  0x25   : > { %p947_p6 = pneg %p946_p10 }
  0x27   : > { %p954_p2 = pnand %p953_p8, %p947_p6 }
  0x29   : > { %957 = shalt.err (!%p954_p2)
}
  0x2a   : > { %s1077_s10 = smov 128   ;;  %s1078_s11 = smov 8  }
  0x2b   : > { %862 = dma.hbm_to_vmem [thread:$0]  (!%p1168_p11), %s1368_s2, 2048, %s153_s26, [#allocation6], %s1077_s10, %s1077_s10, %s1078_s11  }
  0x2c   : > { %p34_p1 = scmp.ge.s32.totalorder %s32_s28, 2  ;;  %s41_s25 = sadd.s32 1, %s1062_s14 }
  0x2d   : > { %p48_p2 = scmp.ne.s32.totalorder %s1062_s14, %s1058_s13  ;;  %p49_p4 = scmp.eq.s32.totalorder %s1074_s17, 0 }
  0x2e   : > { %s1395_s28 = smov (%p34_p1, %s32_s28), 0  ;;  %p1381_p8 = scmp.ne.s32.totalorder %s1375_s21, 0 }
  0x2f   : > { %p1198_p6 = por %p49_p4, %p48_p2  ;;  %s38_s30 = ssub.s32 %s1070_s16, %s1395_s28 }
  0x30   : > { %p1204_p10 = por %p1381_p8, %p48_p2  ;;  %p872_p12 = scmp.lt.s32.totalorder %s1074_s17, 2 }
  0x31   : > { %p39_p11 = scmp.eq.s32.totalorder %s38_s30, 0  ;;  %s166_s26 = sand.u32 1, %s1062_s14  }
  0x32   : > { %s640_s4 = sshll.u32 %s166_s26, 7  ;;  %s654_s6 = sshll.u32 %s1070_s16, 11 }
  0x33   : > { %s1213_s5 = scalar_select %p39_p11, %s1062_s14, %s41_s25  }
  0x34   : > { %s1219_s9 = scalar_lea.hbm %s1366_s0, %s654_s6  ;;  %s170_s21 = scalar_lea.vmem [#allocation2], %s640_s4 }
  0x35   : > { %s178_s18 = sshll.u32 %s170_s21, 4  ;;  %p1225_p13 = pnand %p872_p12, %p1198_p6  ;;  %s1221_s18 = int_to_ptr.vmem [resolvable:$true] %s178_s18 }
  0x36   : > { %s1229_s25 = scalar_lea.sflag [#allocation3], %s166_s26  ;;  %s958_s30 = scalar_lea.hbm %s1219_s9, 2048 }
  0x37   : > { %p959_p0 = scmp.ne.s32.totalorder %s1219_s9, %s958_s30  ;;  %p960_p3 = pneg %p1225_p13 }
  0x38   : > { %s963_s29 = scalar_lea.hbm %s1366_s0, 4096  ;;  %p964_p9 = scmp.lt.u32.totalorder %s1219_s9, %s1366_s0 }
  0x39   : > { %p961_p5 = pnand %p960_p3, %p959_p0  ;;  %p965_p1 = scmp.lt.u32.totalorder %s963_s29, %s958_s30 }
  0x3a   : > { %p967_p4 = scmp.lt.u32.totalorder %s958_s30, %s1219_s9 }
  0x3b   : > { %p962_p7 = pneg %p961_p5  ;;  %p966_p2 = por %p965_p1, %p964_p9 }
  0x3d   : > { %p968_p6 = por %p967_p4, %p966_p2 }
  0x3f   : > { %p969_p8 = pnand %p968_p6, %p962_p7 }
  0x41   : > { %972 = shalt.err (!%p969_p8)
}
  0x42   : > { %s973_s26 = scalar_lea.vmem %s1221_s18, 2048  ;;  %s1079_s21 = smov [#allocation2]  }
  0x43   : > { %p974_p12 = scmp.ne.s32.totalorder %s1221_s18, %s973_s26  ;;  %s978_s4 = sshll.u32 %s1079_s21, 4  ;;  %s979_s4 = int_to_ptr.vmem [resolvable:$false] %s978_s4 }
  0x44   : > { %s980_s6 = scalar_lea.vmem %s979_s4, 4096  ;;  %p981_p5 = scmp.lt.s32.totalorder %s1221_s18, %s979_s4 }
  0x45   : > { %p976_p11 = pnand %p974_p12, %p960_p3  ;;  %p982_p9 = scmp.lt.s32.totalorder %s980_s6, %s973_s26 }
  0x47   : > { %p977_p0 = pneg %p976_p11  ;;  %p983_p1 = por %p982_p9, %p981_p5 }
  0x49   : > { %p984_p2 = pnand %p983_p1, %p977_p0 }
  0x4b   : > { %987 = shalt.err (!%p984_p2)
}
  0x4c   : > { %866 = dma.hbm_to_vmem [thread:$0]  (!%p1225_p13), %s1219_s9, 2048, %s1221_s18, %s1229_s25, %s1077_s10, %s1077_s10, %s1078_s11  }
  0x4d   : > { %p1384_p3 = scmp.ne.s32.totalorder %s1378_s24, 0 }
  0x4e   : > { %s1263_s30 = sand.u32 (!%p1384_p3), 1, %s1058_s13   ;;  %p1385_p7 = scmp.ne.s32.totalorder (!%p1384_p3), %s1376_s22, 0 }
  0x4f   : > { %198 = sbr.rel (%p1384_p3) target bundleno = 601 (0x259), region = 32  ;;  %s644_s29 = sshll.u32 (!%p1384_p3), %s1263_s30, 7 }
  0x50   : > { %s201_s7 = scalar_lea.sflag (!%p1384_p3), [#allocation3], %s1263_s30  ;;  %s1267_s8 = scalar_lea.vmem (!%p1384_p3), [#allocation2], %s644_s29 }
  0x56   : > { %1041 = dma.done.wait (%p1385_p7), %s201_s7, 2048  }
  0x57   : > { %1043 = vsyncadd (%p1385_p7), %s201_s7, 4294965248  ;;  %p1386_p13 = scmp.ne.s32.totalorder %s1374_s20, 0 }
  0x59   : > { %1045 = dma.done.wait (%p1386_p13), [#allocation6], 2048  }
  0x5a   : > { %1047 = vsyncadd (%p1386_p13), [#allocation6], 4294965248  ;;  %v263_v0 = vld [vmem:[#allocation5] sm:$0xff]  ;;  %v264_v1 = vld [vmem:[#allocation5 + $0x8] sm:$0xff]  ;;  %v1080_v40 = vmov 0.0|0.0   ;;  %s646_s20 = sshll.u32 %s1263_s30, 1 }
  0x5b   : > { %v265_v2 = vld [vmem:[#allocation5 + $0x10] sm:$0xff]  ;;  %v795_v3 = vpack.c.bf16 %v264_v1, %v263_v0  ;;  %v266_v4 = vld [vmem:[#allocation5 + $0x18] sm:$0xff]  ;;  %v267_v6 = vld [vmem:[#allocation5 + $0x20] sm:$0xff]  ;;  %827 = vmatprep.subr.bf16.mxu1 %v1080_v40  ;;  %vm1081_vm0 = vmmov 0   ;;  %v1082_v41 = vmov 0.0   ;;  %s1295_s22 = scalar_lea.vmem [#allocation7], %s646_s20 }
  0x5c   : > { %v799_v5 = vpack.c.bf16 %v266_v4, %v265_v2  ;;  %v268_v7 = vld [vmem:[#allocation5 + $0x28] sm:$0xff]  ;;  %v247_v9 = vld [vmem:[%s1267_s8] sm:$0xff]  ;;  %v269_v10 = vld [vmem:[#allocation5 + $0x30] sm:$0xff]  ;;  %792 = vmatprep.mubr.msk.f32.mxu1 %vm1081_vm0, %v1082_v41  ;;  %246 = vst [vmem:[%s1295_s22] sm:$0x3] %v1082_v41  ;;  %p238_p4 = scmp.lt.s32.totalorder %s1066_s15, 1  ;;  %s651_s18 = sshll.u32 %s1066_s15, 5 }
  0x5d   : > { %796 = vmatprep.subr.bf16.mxu0 %v795_v3  ;;  %v803_v8 = vpack.c.bf16 %v268_v7, %v267_v6  ;;  %v270_v11 = vld [vmem:[#allocation5 + $0x38] sm:$0xff]  ;;  %736 = vmatprep.mubr.f32.mxu0 %v247_v9  ;;  %v271_v13 = vld [vmem:[#allocation5 + $0x40] sm:$0xff]  ;;  %v272_v14 = vld [vmem:[#allocation5 + $0x48] sm:$0xff]  ;;  %s537_s19 = sshll.u32 %s1295_s22, 4  ;;  %s1316_s21 = scalar_lea.hbm %s1369_s3, %s651_s18  ;;  %s1318_s19 = int_to_ptr.vmem [resolvable:$true] %s537_s19 }
  0x5e   : > { %798 = vmatpush3.bf16.msra.mxu0 %v795_v3  ;;  %v807_v12 = vpack.c.bf16 %v270_v11, %v269_v10  ;;  %v811_v15 = vpack.c.bf16 %v272_v14, %v271_v13  ;;  %v273_v16 = vld [vmem:[#allocation5 + $0x50] sm:$0xff]  ;;  %v274_v17 = vld [vmem:[#allocation5 + $0x58] sm:$0xff]  ;;  %v275_v19 = vld [vmem:[#allocation5 + $0x60] sm:$0xff]  ;;  %s239_s24 = scalar_select %p238_p4, %s1066_s15, 1 }
  0x5f   : > { %800 = vmatprep.subr.bf16.mxu0 %v799_v5  ;;  %v815_v18 = vpack.c.bf16 %v274_v17, %v273_v16  ;;  %v276_v20 = vld [vmem:[#allocation5 + $0x68] sm:$0xff]  ;;  %v277_v22 = vld [vmem:[#allocation5 + $0x70] sm:$0xff]  ;;  %v278_v23 = vld [vmem:[#allocation5 + $0x78] sm:$0xff]  ;;  %s524_s4 = scalar_lea.sflag [#allocation4], %s1263_s30  ;;  %s988_s6 = scalar_lea.vmem %s1318_s19, 32 }
  0x60   : > { %v819_v21 = vpack.c.bf16 %v276_v20, %v275_v19  ;;  %v823_v24 = vpack.c.bf16 %v278_v23, %v277_v22  ;;  %v248_v25 = vld [vmem:[%s1267_s8 + $0x8] sm:$0xff]  ;;  %v249_v26 = vld [vmem:[%s1267_s8 + $0x10] sm:$0xff]  ;;  %v250_v27 = vld [vmem:[%s1267_s8 + $0x18] sm:$0xff]  ;;  %s240_s9 = scalar_lea.vmem %s1367_s1, %s239_s24  ;;  %p989_p6 = scmp.ne.s32.totalorder %s1318_s19, %s988_s6 }
  0x61   : > { %v251_v28 = vld [vmem:[%s1267_s8 + $0x20] sm:$0xff]  ;;  %v252_v29 = vld [vmem:[%s1267_s8 + $0x28] sm:$0xff]  ;;  %v253_v30 = vld [vmem:[%s1267_s8 + $0x30] sm:$0xff]  ;;  %s1084_s15 = smov [#allocation7]  }
  0x62   : > { %802 = vmatpush3.bf16.msra.mxu0 %v799_v5  ;;  %v254_v31 = vld [vmem:[%s1267_s8 + $0x38] sm:$0xff]  ;;  %v255_v32 = vld [vmem:[%s1267_s8 + $0x40] sm:$0xff]  ;;  %v256_v33 = vld [vmem:[%s1267_s8 + $0x48] sm:$0xff]  ;;  %p990_p8 = pnand %p989_p6, %p1204_p10  ;;  %s992_s29 = sshll.u32 %s1084_s15, 4  ;;  %s993_s29 = int_to_ptr.vmem [resolvable:$false] %s992_s29 }
  0x63   : > { %804 = vmatprep.subr.bf16.mxu0 %v803_v8  ;;  %v257_v34 = vld [vmem:[%s1267_s8 + $0x50] sm:$0xff]  ;;  %v258_v35 = vld [vmem:[%s1267_s8 + $0x58] sm:$0xff]  ;;  %v259_v36 = vld [vmem:[%s1267_s8 + $0x60] sm:$0xff]  ;;  %s994_s7 = scalar_lea.vmem %s993_s29, 64  ;;  %p995_p11 = scmp.lt.s32.totalorder %s1318_s19, %s993_s29 }
  0x64   : > { %v260_v37 = vld [vmem:[%s1267_s8 + $0x68] sm:$0xff]  ;;  %v261_v38 = vld [vmem:[%s1267_s8 + $0x70] sm:$0xff]  ;;  %v262_v39 = vld [vmem:[%s1267_s8 + $0x78] sm:$0xff]  ;;  %p991_p12 = pneg %p990_p8  ;;  %p996_p0 = scmp.lt.s32.totalorder %s994_s7, %s988_s6 }
  0x65   : > { %v647_v19 = vld [vmem:[%s240_s9] ss:$0 sm:$0xff] }
  0x66   : > { %806 = vmatpush3.bf16.msra.mxu0 %v803_v8  ;;  %v450_v22 = vld [vmem:[%s1295_s22] sm:$0x3]  ;;  %p997_p5 = por %p996_p0, %p995_p11 }
  0x67   : > { %808 = vmatprep.subr.bf16.mxu0 %v807_v12 }
  0x68   : > { %p998_p9 = pnand %p997_p5, %p991_p12 }
  0x6a   : > { %810 = vmatpush3.bf16.msra.mxu0 %v807_v12  ;;  %v440_v12 = vlaneseq }
  0x6b   : > { %812 = vmatprep.subr.bf16.mxu0 %v811_v15 }
  0x6e   : > { %814 = vmatpush3.bf16.msra.mxu0 %v811_v15 }
  0x6f   : > { %816 = vmatprep.subr.bf16.mxu0 %v815_v18 }
  0x72   : > { %818 = vmatpush3.bf16.msra.mxu0 %v815_v18  ;;  %v441_v18 = vshrl.u32 %v440_v12, 7 }
  0x73   : > { %820 = vmatprep.subr.bf16.mxu0 %v819_v21 }
  0x74   : > { %vm447_vm1 = vcmp.eq.s32.totalorder %v441_v18, %v647_v19 }
  0x76   : > { %822 = vmatpush3.bf16.msra.mxu0 %v819_v21  ;;  %v1083_v21 = vmov 1.0  }
  0x77   : > { %824 = vmatprep.subr.bf16.mxu0 %v823_v24 }
  0x7a   : > { %826 = vmatpush3.bf16.msra.mxu0 %v823_v24 }
  0x7d   : > { %737 = vmatmul.mubr.f32.vlgmr.msra.gmra.mrb[0].mxu0 %v248_v25 }
  0x7e   : > { %739 = vmatprep.mubr.f32.mxu0 %v249_v26 }
  0x81   : > { %740 = vmatmul.mubr.f32.gmra.mrb[2].mxu0 %v250_v27 }
  0x82   : > { %742 = vmatprep.mubr.f32.mxu0 %v251_v28 }
  0x85   : > { %743 = vmatmul.mubr.f32.gmra.mrb[4].mxu0 %v252_v29 }
  0x86   : > { %745 = vmatprep.mubr.f32.mxu0 %v253_v30 }
  0x89   : > { %746 = vmatmul.mubr.f32.gmra.mrb[6].mxu0 %v254_v31 }
  0x8a   : > { %748 = vmatprep.mubr.f32.mxu0 %v255_v32 }
  0x8d   : > { %749 = vmatmul.mubr.f32.gmra.mrb[8].mxu0 %v256_v33 }
  0x8e   : > { %751 = vmatprep.mubr.f32.mxu0 %v257_v34 }
  0x91   : > { %752 = vmatmul.mubr.f32.gmra.mrb[10].mxu0 %v258_v35 }
  0x92   : > { %754 = vmatprep.mubr.f32.mxu0 %v259_v36 }
  0x95   : > { %755 = vmatmul.mubr.f32.gmra.mrb[12].mxu0 %v260_v37 }
  0x96   : > { %757 = vmatprep.mubr.f32.mxu0 %v261_v38 }
  0x99   : > { %758 = vmatmul.mubr.f32.gmra.mrb[14].mxu0 %v262_v39 }
 0x150   : > { %v738_v42 = vpop.f32.mrb[0].mxu0 }
 0x151   : > { %v425_v43 = vmax.f32 %v738_v42, 0.0  ;;  %v345_v44 = vpop.f32.mrb[1].mxu0 }
 0x152   : > { %v424_v45 = vmax.f32 %v345_v44, 0.0 }
 0x154   : > { %v741_v46 = vpop.f32.mrb[2].mxu0  ;;  %v828_v47 = vpack.c.bf16 %v425_v43, %v424_v45 }
 0x155   : > { %v427_v48 = vmax.f32 %v741_v46, 0.0  ;;  %v355_v49 = vpop.f32.mrb[3].mxu0 }
 0x156   : > { %v426_v50 = vmax.f32 %v355_v49, 0.0  ;;  %829 = vmatpush3.bf16.msra.mxu1 %v828_v47 }
 0x157   : > { %830 = vmatprep.subr.bf16.mxu1 %v1080_v40 }
 0x158   : > { %v831_v51 = vpack.c.bf16 %v427_v48, %v426_v50  ;;  %v744_v52 = vpop.f32.mrb[4].mxu0 }
 0x159   : > { %v429_v53 = vmax.f32 %v744_v52, 0.0  ;;  %v365_v54 = vpop.f32.mrb[5].mxu0 }
 0x15a   : > { %v428_v55 = vmax.f32 %v365_v54, 0.0  ;;  %832 = vmatpush3.bf16.msra.mxu1 %v831_v51 }
 0x15b   : > { %833 = vmatprep.subr.bf16.mxu1 %v1080_v40 }
 0x15c   : > { %v834_v56 = vpack.c.bf16 %v429_v53, %v428_v55  ;;  %v747_v57 = vpop.f32.mrb[6].mxu0 }
 0x15d   : > { %v431_v58 = vmax.f32 %v747_v57, 0.0  ;;  %v375_v59 = vpop.f32.mrb[7].mxu0 }
 0x15e   : > { %v430_v60 = vmax.f32 %v375_v59, 0.0  ;;  %835 = vmatpush3.bf16.msra.mxu1 %v834_v56 }
 0x15f   : > { %836 = vmatprep.subr.bf16.mxu1 %v1080_v40 }
 0x160   : > { %v837_v61 = vpack.c.bf16 %v431_v58, %v430_v60  ;;  %v750_v62 = vpop.f32.mrb[8].mxu0 }
 0x161   : > { %v433_v63 = vmax.f32 %v750_v62, 0.0  ;;  %v385_v0 = vpop.f32.mrb[9].mxu0 }
 0x162   : > { %v432_v1 = vmax.f32 %v385_v0, 0.0  ;;  %838 = vmatpush3.bf16.msra.mxu1 %v837_v61 }
 0x163   : > { %839 = vmatprep.subr.bf16.mxu1 %v1080_v40 }
 0x164   : > { %v840_v2 = vpack.c.bf16 %v433_v63, %v432_v1  ;;  %v753_v3 = vpop.f32.mrb[10].mxu0 }
 0x165   : > { %v435_v4 = vmax.f32 %v753_v3, 0.0  ;;  %v395_v5 = vpop.f32.mrb[11].mxu0 }
 0x166   : > { %v434_v6 = vmax.f32 %v395_v5, 0.0  ;;  %841 = vmatpush3.bf16.msra.mxu1 %v840_v2 }
 0x167   : > { %842 = vmatprep.subr.bf16.mxu1 %v1080_v40 }
 0x168   : > { %v843_v7 = vpack.c.bf16 %v435_v4, %v434_v6  ;;  %v756_v8 = vpop.f32.mrb[12].mxu0 }
 0x169   : > { %v437_v9 = vmax.f32 %v756_v8, 0.0  ;;  %v405_v10 = vpop.f32.mrb[13].mxu0 }
 0x16a   : > { %v436_v11 = vmax.f32 %v405_v10, 0.0  ;;  %844 = vmatpush3.bf16.msra.mxu1 %v843_v7 }
 0x16b   : > { %845 = vmatprep.subr.bf16.mxu1 %v1080_v40 }
 0x16c   : > { %v846_v13 = vpack.c.bf16 %v437_v9, %v436_v11  ;;  %v759_v14 = vpop.f32.mrb[14].mxu0 }
 0x16d   : > { %v439_v15 = vmax.f32 %v759_v14, 0.0  ;;  %v415_v16 = vpop.f32.mrb[15].mxu0 }
 0x16e   : > { %v438_v17 = vmax.f32 %v415_v16, 0.0  ;;  %847 = vmatpush3.bf16.msra.mxu1 %v846_v13 }
 0x16f   : > { %848 = vmatprep.subr.bf16.mxu1 %v1080_v40 }
 0x170   : > { %v849_v20 = vpack.c.bf16 %v439_v15, %v438_v17 }
 0x172   : > { %850 = vmatpush3.bf16.msra.mxu1 %v849_v20 }
 0x175   : > { %793 = vmatmul.mubr.msk.f32.vlgmr.msra.gmra.mrb[0].mxu1 %vm447_vm1, %v1083_v21 }
 0x248   : > { %v517_v23 = vpop.f32.mrb[0].mxu1 }
 0x249   : > { %v521_v24 = vadd.f32 %v517_v23, %v450_v22  ;;  %v794_v25 = vpop.f32.mrb[1].mxu1 }
 0x24b   : > { %522 = vst [vmem:[%s1295_s22] sm:$0x3] %v521_v24 }
 0x24c   : > { %1001 = shalt.err (!%p998_p9)
}
 0x24d   : > { %s1002_s30 = scalar_lea.hbm %s1316_s21, 32  ;;  %s1006_s22 = scalar_lea.hbm %s1369_s3, 64 }
 0x24e   : > { %p1003_p1 = scmp.ne.s32.totalorder %s1316_s21, %s1002_s30  ;;  %p1007_p7 = scmp.lt.u32.totalorder %s1316_s21, %s1369_s3 }
 0x24f   : > { %p1008_p13 = scmp.lt.u32.totalorder %s1006_s22, %s1002_s30  ;;  %p1010_p6 = scmp.lt.u32.totalorder %s1002_s30, %s1316_s21 }
 0x250   : > { %p1004_p2 = pnand %p1003_p1, %p1204_p10 }
 0x251   : > { %p1009_p4 = por %p1008_p13, %p1007_p7 }
 0x252   : > { %p1005_p3 = pneg %p1004_p2 }
 0x253   : > { %p1011_p8 = por %p1010_p6, %p1009_p4 }
 0x255   : > { %p1012_p12 = pnand %p1011_p8, %p1005_p3 }
 0x257   : > { %1015 = shalt.err (!%p1012_p12)
}
 0x258   : > { %857 = dma.vmem_to_hbm [thread:$0]  (%p1204_p10), %s1318_s19, 32, %s1316_s21, %s524_s4  }
 0x259 PF: > { %s549_s11 = sand.u32 1, %s1054_s12   ;;  %p1387_p11 = scmp.ne.s32.totalorder %s1377_s23, 0 }
 0x25a   : > { %p1388_p0 = scmp.ge.s32.totalorder %s1074_s17, 2  ;;  %s550_s9 = scalar_lea.sflag [#allocation4], %s549_s11 }
 0x25c   : > { %p868_p5 = pnand %p1388_p0, %p1387_p11 }
 0x25e   : > { %1049 = dma.done.wait (!%p868_p5), %s550_s9, 32  }
 0x25f   : > { %1051 = vsyncadd (!%p868_p5), %s550_s9, 4294967264  ;;  %s20_s17 = sadd.s32 1, %s1074_s17   ;;  %s1389_s12 = smov %s1058_s13 }
 0x260   : > { %p17_p9 = scmp.ge.s32.totalorder %s20_s17, 4   ;;  %s1390_s13 = smov %s1062_s14 }
 0x261   : > { %s1391_s14 = smov %s1213_s5  ;;  %s1392_s15 = smov %s1070_s16 }
 0x262   : > { %s1393_s16 = smov %s1395_s28  ;;  %19 = sbr.rel (!%p17_p9) target bundleno = 7 (0x7), region = 88 }
 0x269   :  { %555 = vsyncpa [#allocation3], 1 }
 0x26a   :  { %557 = vsyncpa [#allocation3 + $0x1], 1 }
 0x26b   :  { %558 = vsyncpa [#allocation6], 1 }
 0x26c   :  { %559 = vsyncpa [#allocation4], 1 }
 0x26d   :  { %561 = vsyncpa [#allocation4 + $0x1], 1 }

</bundles_post_ra>
